<compile_context>
chip_gen: v7x
topology: tpu7x:2x2x1
jax: 0.10.0
libtpu: 0.0.40
codegen_flags: <defaults>
</compile_context>

<pallas_src>
import math
import functools

import jax
import jax.numpy as jnp
from jax import lax
from jax.experimental import pallas as pl
from jax.experimental.pallas import tpu as pltpu


def _hyperbolic_mse_kernel(pred_ref, target_ref, out_ref, *, c):
    x = pred_ref[...].astype(jnp.float32)    # (B, D)
    y = target_ref[...].astype(jnp.float32)  # (B, D)
    B = x.shape[0]

    sqrt_c = math.sqrt(c)                    # Python floats -> weak f32 consts
    lo_sq = 1e-30                            # (1e-15)**2
    hi_sq = (1.0 - 1e-5) ** 2

    # Squared norms along the feature (lane) axis; clamping in the squared
    # domain is equivalent to clamping the norm to [1e-15, 1-1e-5] and squaring.
    x_sq = jnp.clip(jnp.sum(x * x, axis=-1, keepdims=True), lo_sq, hi_sq)   # (B, 1)
    y_sq = jnp.clip(jnp.sum(y * y, axis=-1, keepdims=True), lo_sq, hi_sq)   # (B, 1)

    diff = x - y
    num = jnp.maximum(
        jnp.sqrt(jnp.sum(diff * diff, axis=-1, keepdims=True)), 1e-15)      # (B, 1)

    den = jnp.maximum((1.0 - c * x_sq) * (1.0 - c * y_sq), 1e-15)           # (B, 1)
    inv_sqrt_den = lax.rsqrt(den)            # one EUP rsqrt on the whole column

    # Full (B, B) cross matrix: outer[i, j] = inv_sqrt_den[i] * num[j].
    # Built as a single K=1 rhs-transposed matmul (MXU is idle anyway) so no
    # in-kernel sublane->lane relayout of the (B, 1) column is needed.
    outer = lax.dot_general(
        inv_sqrt_den, num,
        dimension_numbers=(((1,), (1,)), ((), ())),
        preferred_element_type=jnp.float32)                                 # (B, B)

    # arg > 0 always, so only the upper clamp is live.
    arg = jnp.minimum(sqrt_c * outer, 1.0 - 1e-7)

    # Numerically stable atanh:
    #   small arg  -> odd series x + x^3/3 + x^5/5 + x^7/7 + x^9/9
    #   larger arg -> 0.5 * (log(1 + x) - log(1 - x))
    log_form = 0.5 * (jnp.log(1.0 + arg) - jnp.log(1.0 - arg))
    a2 = arg * arg
    series = arg * (1.0 + a2 * (1.0 / 3.0
                     + a2 * (1.0 / 5.0
                     + a2 * (1.0 / 7.0
                     + a2 * (1.0 / 9.0)))))
    atanh = jnp.where(arg < 0.2, series, log_form)

    dist = (2.0 / sqrt_c) * atanh                                           # (B, B)
    total = jnp.sum(dist * dist)             # full reduce -> scalar
    out_ref[0, 0] = total * (1.0 / (B * B))  # mean over the B*B broadcast entries


def hyperbolic_mse_loss(pred, target, c=1.0):
    kernel = functools.partial(_hyperbolic_mse_kernel, c=float(c))
    out = pl.pallas_call(
        kernel,
        out_shape=jax.ShapeDtypeStruct((1, 1), jnp.float32),
        in_specs=[
            pl.BlockSpec(memory_space=pltpu.MemorySpace.VMEM),
            pl.BlockSpec(memory_space=pltpu.MemorySpace.VMEM),
        ],
        out_specs=pl.BlockSpec(memory_space=pltpu.MemorySpace.SMEM),
    )(pred, target)
    return out[0, 0]


def _reference_loss(pred, target, c=1.0):
    # Pure-JAX replica of the PyTorch forward (including the (B, B) broadcast).
    c = jnp.float32(c)
    x_norm = jnp.clip(jnp.linalg.norm(pred, axis=-1, keepdims=True), 1e-15, 1.0 - 1e-5)
    y_norm = jnp.clip(jnp.linalg.norm(target, axis=-1, keepdims=True), 1e-15, 1.0 - 1e-5)
    num = jnp.maximum(jnp.linalg.norm(pred - target, axis=-1), 1e-15)            # (B,)
    den = jnp.maximum((1 - c * x_norm ** 2) * (1 - c * y_norm ** 2), 1e-15)      # (B, 1)
    arg = jnp.clip(jnp.sqrt(c) * num / jnp.sqrt(den), -1.0 + 1e-7, 1.0 - 1e-7)   # (B, B)
    dist = 2.0 / jnp.sqrt(c) * jnp.arctanh(arg)
    return jnp.mean(dist ** 2)


if __name__ == "__main__":
    key = jax.random.PRNGKey(0)
    k1, k2 = jax.random.split(key)
    B, D = 8, 32

    # Points well inside the Poincare ball; target close to pred so the
    # rsqrt / atanh path is exercised in its smooth (un-clipped) region.
    pred = (0.1 * jax.random.normal(k1, (B, D))).astype(jnp.float32)
    target = (pred + 0.02 * jax.random.normal(k2, (B, D))).astype(jnp.float32)

    loss = hyperbolic_mse_loss(pred, target, c=1.0)
    loss = jax.block_until_ready(loss)
    ref = _reference_loss(pred, target, c=1.0)
    assert jnp.allclose(loss, ref, rtol=1e-5, atol=1e-6), (loss, ref)

    # Small-argument regime (pred ~ target): exercises the stable-atanh path.
    target2 = (pred + 1e-4 * jax.random.normal(k2, (B, D))).astype(jnp.float32)
    loss2 = jax.block_until_ready(hyperbolic_mse_loss(pred, target2, c=1.0))
    ref2 = _reference_loss(pred, target2, c=1.0)
    assert jnp.allclose(loss2, ref2, rtol=1e-4, atol=1e-9), (loss2, ref2)

    print("KERNEL_OK")
</pallas_src>

<mosaic_0001>
module attributes {stable_mosaic.version = 11 : i64} {
  func.func @_hyperbolic_mse_kernel(%arg0: memref<8x32xf32, #tpu.memory_space<vmem>>, %arg1: memref<8x32xf32, #tpu.memory_space<vmem>>, %arg2: memref<1x1xf32, #tpu.memory_space<smem>>) attributes {dimension_semantics = [], scalar_prefetch = 0 : i64, scratch_operands = 0 : i64, tpu.core_type = #tpu.core_type<tc>} {
    %c0 = arith.constant 0 : index
    %c0_0 = arith.constant 0 : index
    %0 = vector.load %arg0[%c0, %c0_0] : memref<8x32xf32, #tpu.memory_space<vmem>>, vector<8x32xf32>
    %c0_1 = arith.constant 0 : index
    %c0_2 = arith.constant 0 : index
    %1 = vector.load %arg1[%c0_1, %c0_2] : memref<8x32xf32, #tpu.memory_space<vmem>>, vector<8x32xf32>
    %2 = arith.mulf %0, %0 : vector<8x32xf32>
    %cst = arith.constant dense<0.000000e+00> : vector<8xf32>
    %3 = vector.multi_reduction <add>, %2, %cst [1] : vector<8x32xf32> to vector<8xf32>
    %4 = vector.shape_cast %3 : vector<8xf32> to vector<8x1xf32>
    %cst_3 = arith.constant 1.000000e-30 : f32
    %cst_4 = arith.constant 0.999979972 : f32
    %5 = vector.broadcast %cst_3 : f32 to vector<8x1xf32>
    %6 = arith.maximumf %5, %4 : vector<8x1xf32>
    %7 = vector.broadcast %cst_4 : f32 to vector<8x1xf32>
    %8 = arith.minimumf %7, %6 : vector<8x1xf32>
    %9 = arith.mulf %1, %1 : vector<8x32xf32>
    %cst_5 = arith.constant dense<0.000000e+00> : vector<8xf32>
    %10 = vector.multi_reduction <add>, %9, %cst_5 [1] : vector<8x32xf32> to vector<8xf32>
    %11 = vector.shape_cast %10 : vector<8xf32> to vector<8x1xf32>
    %cst_6 = arith.constant 1.000000e-30 : f32
    %cst_7 = arith.constant 0.999979972 : f32
    %12 = vector.broadcast %cst_6 : f32 to vector<8x1xf32>
    %13 = arith.maximumf %12, %11 : vector<8x1xf32>
    %14 = vector.broadcast %cst_7 : f32 to vector<8x1xf32>
    %15 = arith.minimumf %14, %13 : vector<8x1xf32>
    %16 = arith.subf %0, %1 : vector<8x32xf32>
    %17 = arith.mulf %16, %16 : vector<8x32xf32>
    %cst_8 = arith.constant dense<0.000000e+00> : vector<8xf32>
    %18 = vector.multi_reduction <add>, %17, %cst_8 [1] : vector<8x32xf32> to vector<8xf32>
    %19 = vector.shape_cast %18 : vector<8xf32> to vector<8x1xf32>
    %20 = math.sqrt %19 : vector<8x1xf32>
    %cst_9 = arith.constant 1.000000e-15 : f32
    %21 = vector.broadcast %cst_9 : f32 to vector<8x1xf32>
    %22 = arith.maximumf %20, %21 : vector<8x1xf32>
    %cst_10 = arith.constant 1.000000e+00 : f32
    %23 = vector.broadcast %cst_10 : f32 to vector<8x1xf32>
    %24 = arith.mulf %23, %8 : vector<8x1xf32>
    %cst_11 = arith.constant 1.000000e+00 : f32
    %25 = vector.broadcast %cst_11 : f32 to vector<8x1xf32>
    %26 = arith.subf %25, %24 : vector<8x1xf32>
    %cst_12 = arith.constant 1.000000e+00 : f32
    %27 = vector.broadcast %cst_12 : f32 to vector<8x1xf32>
    %28 = arith.mulf %27, %15 : vector<8x1xf32>
    %cst_13 = arith.constant 1.000000e+00 : f32
    %29 = vector.broadcast %cst_13 : f32 to vector<8x1xf32>
    %30 = arith.subf %29, %28 : vector<8x1xf32>
    %31 = arith.mulf %26, %30 : vector<8x1xf32>
    %cst_14 = arith.constant 1.000000e-15 : f32
    %32 = vector.broadcast %cst_14 : f32 to vector<8x1xf32>
    %33 = arith.maximumf %31, %32 : vector<8x1xf32>
    %34 = math.rsqrt %33 : vector<8x1xf32>
    %cst_15 = arith.constant dense<0.000000e+00> : vector<8x8xf32>
    %35 = tpu.matmul %34, %22, %cst_15 {dimension_numbers = #tpu.dot_dimension_numbers<[1], [1], [0], [0], [0, 0, 1, 0], [], []>} : vector<8x1xf32>, vector<8x1xf32>, vector<8x8xf32> -> vector<8x8xf32>
    %cst_16 = arith.constant 1.000000e+00 : f32
    %36 = vector.broadcast %cst_16 : f32 to vector<8x8xf32>
    %37 = arith.mulf %36, %35 : vector<8x8xf32>
    %cst_17 = arith.constant 0.99999988 : f32
    %38 = vector.broadcast %cst_17 : f32 to vector<8x8xf32>
    %39 = arith.minimumf %37, %38 : vector<8x8xf32>
    %cst_18 = arith.constant 1.000000e+00 : f32
    %40 = vector.broadcast %cst_18 : f32 to vector<8x8xf32>
    %41 = arith.addf %40, %39 : vector<8x8xf32>
    %42 = math.log %41 : vector<8x8xf32>
    %cst_19 = arith.constant 1.000000e+00 : f32
    %43 = vector.broadcast %cst_19 : f32 to vector<8x8xf32>
    %44 = arith.subf %43, %39 : vector<8x8xf32>
    %45 = math.log %44 : vector<8x8xf32>
    %46 = arith.subf %42, %45 : vector<8x8xf32>
    %cst_20 = arith.constant 5.000000e-01 : f32
    %47 = vector.broadcast %cst_20 : f32 to vector<8x8xf32>
    %48 = arith.mulf %47, %46 : vector<8x8xf32>
    %49 = arith.mulf %39, %39 : vector<8x8xf32>
    %cst_21 = arith.constant 0.111111112 : f32
    %50 = vector.broadcast %cst_21 : f32 to vector<8x8xf32>
    %51 = arith.mulf %49, %50 : vector<8x8xf32>
    %cst_22 = arith.constant 0.142857149 : f32
    %52 = vector.broadcast %cst_22 : f32 to vector<8x8xf32>
    %53 = arith.addf %52, %51 : vector<8x8xf32>
    %54 = arith.mulf %49, %53 : vector<8x8xf32>
    %cst_23 = arith.constant 2.000000e-01 : f32
    %55 = vector.broadcast %cst_23 : f32 to vector<8x8xf32>
    %56 = arith.addf %55, %54 : vector<8x8xf32>
    %57 = arith.mulf %49, %56 : vector<8x8xf32>
    %cst_24 = arith.constant 0.333333343 : f32
    %58 = vector.broadcast %cst_24 : f32 to vector<8x8xf32>
    %59 = arith.addf %58, %57 : vector<8x8xf32>
    %60 = arith.mulf %49, %59 : vector<8x8xf32>
    %cst_25 = arith.constant 1.000000e+00 : f32
    %61 = vector.broadcast %cst_25 : f32 to vector<8x8xf32>
    %62 = arith.addf %61, %60 : vector<8x8xf32>
    %63 = arith.mulf %39, %62 : vector<8x8xf32>
    %cst_26 = arith.constant 2.000000e-01 : f32
    %64 = vector.broadcast %cst_26 : f32 to vector<8x8xf32>
    %65 = arith.cmpf olt, %39, %64 : vector<8x8xf32>
    %66 = arith.select %65, %63, %48 : vector<8x8xi1>, vector<8x8xf32>
    %cst_27 = arith.constant 2.000000e+00 : f32
    %67 = vector.broadcast %cst_27 : f32 to vector<8x8xf32>
    %68 = arith.mulf %67, %66 : vector<8x8xf32>
    %69 = arith.mulf %68, %68 : vector<8x8xf32>
    %70 = vector.shape_cast %69 : vector<8x8xf32> to vector<1x8x8xf32>
    %cst_28 = arith.constant dense<0.000000e+00> : vector<1xf32>
    %71 = vector.multi_reduction <add>, %70, %cst_28 [1, 2] : vector<1x8x8xf32> to vector<1xf32>
    %72 = vector.shape_cast %71 : vector<1xf32> to vector<1x1x1xf32>
    %73 = vector.extract %72[0, 0, 0] : f32 from vector<1x1x1xf32>
    %cst_29 = arith.constant 1.562500e-02 : f32
    %74 = arith.mulf %73, %cst_29 : f32
    %c0_30 = arith.constant 0 : index
    %c0_31 = arith.constant 0 : index
    %75 = memref.load %arg2[%c0_30, %c0_31] : memref<1x1xf32, #tpu.memory_space<smem>>
    memref.store %74, %arg2[%c0_30, %c0_31] : memref<1x1xf32, #tpu.memory_space<smem>>
    return
  }
}

</mosaic_0001>

<bundles_post_ra>
// kernel: tpu_custom_call.1
= control target key start
LH: loop header
LB: loop body
LE: loop exit
PB: predicated region body
PF: predicated region fallthrough
CT: control target
= control target key end

     0   :  { %7 = vsyncpa [#allocation3], 0  ;;  %s338_s0 = inlined_call_operand.hbm [shape: f32[8,32], index: 0, kind: input, shape index: {}]   ;;  %s339_s1 = inlined_call_operand.hbm [shape: f32[8,32], index: 1, kind: input, shape index: {}]   ;;  %s340_s2 = inlined_call_operand.hbm [shape: f32[1,1], index: 2, kind: output, shape index: {}]  }
   0x1   :  { %8 = vsyncpa [#allocation6], 0 }
   0x2   :  { %9 = vsyncpa [#allocation4], 0  ;;  %s282_s9 = smov [#allocation2]   ;;  %s283_s11 = smov [#allocation5]  }
   0x3   :  { %s16_s10 = sshll.u32 %s282_s9, 4  ;;  %s26_s12 = sshll.u32 %s283_s11, 4  ;;  %s17_s10 = int_to_ptr.vmem [resolvable:$true] %s16_s10  ;;  %s27_s12 = int_to_ptr.vmem [resolvable:$true] %s26_s12 }
   0x4   :  { %s222_s15 = scalar_lea.hbm %s338_s0, 128 }
   0x5   :  { %p223_p0 = scmp.ne.s32.totalorder %s338_s0, %s222_s15  ;;  %p226_p1 = scmp.lt.u32.totalorder %s222_s15, %s338_s0 }
   0x7   :  { %p228_p2 = pnand %p226_p1, %p223_p0 }
   0x9   :  { %231 = shalt.err (!%p228_p2)
}
   0xa   :  { %s232_s20 = scalar_lea.vmem %s17_s10, 128  ;;  %p237_p4 = scmp.lt.s32.totalorder %s17_s10, %s17_s10 }
   0xb   :  { %p233_p3 = scmp.ne.s32.totalorder %s17_s10, %s232_s20  ;;  %p238_p5 = scmp.lt.s32.totalorder %s232_s20, %s232_s20 }
   0xd   :  { %p239_p6 = por %p238_p5, %p237_p4 }
   0xf   :  { %p240_p7 = pnand %p239_p6, %p233_p3 }
  0x11   :  { %243 = shalt.err (!%p240_p7)
}
  0x12   :  { %19 = dma.hbm_to_vmem [thread:$0]  %s338_s0, 128, %s17_s10, [#allocation3]  }
  0x13   :  { %s244_s25 = scalar_lea.hbm %s339_s1, 128 }
  0x14   :  { %p245_p8 = scmp.ne.s32.totalorder %s339_s1, %s244_s25  ;;  %p248_p9 = scmp.lt.u32.totalorder %s244_s25, %s339_s1 }
  0x16   :  { %p250_p10 = pnand %p248_p9, %p245_p8 }
  0x18   :  { %253 = shalt.err (!%p250_p10)
}
  0x19   :  { %s254_s30 = scalar_lea.vmem %s27_s12, 128  ;;  %p259_p12 = scmp.lt.s32.totalorder %s27_s12, %s27_s12 }
  0x1a   :  { %p255_p11 = scmp.ne.s32.totalorder %s27_s12, %s254_s30  ;;  %p260_p13 = scmp.lt.s32.totalorder %s254_s30, %s254_s30 }
  0x1c   :  { %p261_p0 = por %p260_p13, %p259_p12 }
  0x1e   :  { %p262_p1 = pnand %p261_p0, %p255_p11 }
  0x20   :  { %265 = shalt.err (!%p262_p1)
}
  0x21   :  { %29 = dma.hbm_to_vmem [thread:$0]  %s339_s1, 128, %s27_s12, [#allocation6]  }
  0x22   :  { %276 = dma.done.wait [#allocation3], 128  }
  0x23   :  { %277 = vsyncadd [#allocation3], 4294967168 }
  0x24   :  { %278 = dma.done.wait [#allocation6], 128  }
  0x25   :  { %279 = vsyncadd [#allocation6], 4294967168  ;;  %v36_v0 = vld [vmem:[#allocation2] sm:$0xff]  ;;  %vm39_vm0 = vcmask 261120   ;;  %v37_v1 = vld [vmem:[#allocation5] sm:$0xff]  ;;  %v284_v9 = vmov 0.0  }
  0x26   :  { %v38_v2 = vmul.f32 %v36_v0, %v36_v0  ;;  %v51_v3 = vsub.f32 %v36_v0, %v37_v1  ;;  %v45_v4 = vmul.f32 %v37_v1, %v37_v1  ;;  %202 = vmatprep.subr.mxu0 %v284_v9  ;;  %vm285_vm1 = vmmov 0   ;;  %s266_s7 = scalar_lea.hbm %s340_s2, 16 }
  0x27   :  { %204 = vmatprep.mubr.msk.f32.mxu0 %vm285_vm1, %v284_v9  ;;  %vm69_vm4 = vcmask 7168   ;;  %vm169_vm6 = vcmask 64512   ;;  %p267_p2 = scmp.ne.s32.totalorder %s340_s2, %s266_s7  ;;  %p270_p3 = scmp.lt.u32.totalorder %s266_s7, %s340_s2 }
  0x28   :  { %v40_v5 = vsel %vm39_vm0, %v38_v2, 0.0  ;;  %v52_v6 = vmul.f32 %v51_v3, %v51_v3  ;;  %v46_v8 = vsel %vm39_vm0, %v45_v4, 0.0 }
  0x29   :  { %41 = vadd.xlane.f32.xlu0 %v40_v5  ;;  %p272_p4 = pnand %p270_p3, %p267_p2 }
  0x2a   :  { %v53_v7 = vsel %vm39_vm0, %v52_v6, 0.0 }
  0x2b   :  { %54 = vadd.xlane.f32.xlu1 %v53_v7 }
  0x2d   :  { %47 = vadd.xlane.f32.xlu0 %v46_v8 }
  0xb6   :  { %v42_v10 = vpop.xlane.xlu0 %41 }
  0xb7   :  { %v43_v11 = vmax.f32 %v42_v10, 1e-30 }
  0xb8   :  { %v55_v12 = vpop.xlane.xlu1 %54 }
  0xb9   :  { %214 = vrsqrt.f32 %v55_v12  ;;  %v44_v14 = vmin.f32 %v43_v11, 0.99998  ;;  %vm58_vm2 = vcmp.eq.f32.partialorder %v55_v12, inf  ;;  %v61_v23 = vand.u32 2147483648, %v55_v12 }
  0xba   :  { %v48_v13 = vpop.xlane.xlu0 %47  ;;  %vm60_vm3 = vcmp.eq.f32.partialorder %v55_v12, 0.0 }
  0xbb   :  { %v49_v15 = vmax.f32 %v48_v13, 1e-30  ;;  %v64_v17 = vsub.f32 1.0, %v44_v14 }
  0xbd   :  { %v50_v16 = vmin.f32 %v49_v15, 0.99998 }
  0xbf   :  { %v65_v18 = vsub.f32 1.0, %v50_v16 }
  0xc1   :  { %v66_v19 = vmul.f32 %v65_v18, %v64_v17 }
  0xc3   :  { %v215_v20 = vpop.eup %214  ;;  %v67_v21 = vmax.f32 %v66_v19, 1e-15 }
  0xc4   :  { %v57_v22 = vmul.f32 %v215_v20, %v55_v12 }
  0xc5   :  { %216 = vrsqrt.f32 %v67_v21 }
  0xc6   :  { %v59_v24 = vsel %vm58_vm2, %v55_v12, %v57_v22 }
  0xc7   :  { %v62_v25 = vsel %vm60_vm3, %v61_v23, %v59_v24 }
  0xc8   :  { %v63_v26 = vmax.f32 %v62_v25, 1e-15 }
  0xca   :  { %203 = vmatpush3.xpose.msk.msra.mxu0 %vm69_vm4, %v63_v26 }
  0xcf   :  { %v217_v27 = vpop.eup %216 }
  0xd0   :  { %205 = vmatmul.mubr.msk.f32.vlgmr.msra.gmra.mrb[0].mxu0 %vm69_vm4, %v217_v27 }
 0x1a3   :  { %v142_v28 = vpop.f32.mrb[0].mxu0 }
 0x1a4   :  { %v146_v29 = vmin.f32 %v142_v28, 0.9999999  ;;  %v206_v30 = vpop.f32.mrb[1].mxu0 }
 0x1a6   :  { %v147_v31 = vadd.f32 1.0, %v146_v29  ;;  %v150_v32 = vsub.f32 1.0, %v146_v29  ;;  %v155_v33 = vmul.f32 %v146_v29, %v146_v29  ;;  %vm165_vm5 = vcmp.lt.f32.partialorder %v146_v29, 0.2 }
 0x1a8   :  { %218 = vlog2.f32 %v147_v31  ;;  %v156_v34 = vmul.f32 0.11111111, %v155_v33 }
 0x1a9   :  { %220 = vlog2.f32 %v150_v32 }
 0x1aa   :  { %v157_v35 = vadd.f32 0.14285715, %v156_v34 }
 0x1ac   :  { %v158_v36 = vmul.f32 %v157_v35, %v155_v33 }
 0x1ae   :  { %v159_v37 = vadd.f32 0.2, %v158_v36 }
 0x1b0   :  { %v160_v38 = vmul.f32 %v159_v37, %v155_v33 }
 0x1b2   :  { %v219_v39 = vpop.eup %218  ;;  %v161_v40 = vadd.f32 0.33333334, %v160_v38 }
 0x1b3   :  { %v221_v41 = vpop.eup %220  ;;  %v149_v42 = vmul.f32 0.6931472, %v219_v39 }
 0x1b4   :  { %v152_v43 = vmul.f32 0.6931472, %v221_v41  ;;  %v162_v44 = vmul.f32 %v161_v40, %v155_v33 }
 0x1b6   :  { %v153_v45 = vsub.f32 %v149_v42, %v152_v43  ;;  %v163_v46 = vadd.f32 1.0, %v162_v44 }
 0x1b8   :  { %v154_v47 = vmul.f32 0.5, %v153_v45  ;;  %v164_v48 = vmul.f32 %v163_v46, %v146_v29 }
 0x1ba   :  { %v166_v49 = vsel %vm165_vm5, %v164_v48, %v154_v47 }
 0x1bb   :  { %v167_v50 = vmul.f32 2.0, %v166_v49 }
 0x1bd   :  { %v168_v51 = vmul.f32 %v167_v50, %v167_v50 }
 0x1bf   :  { %v170_v52 = vsel %vm169_vm6, %v168_v51, 0.0 }
 0x1c0   :  { %171 = vadd.xlane.f32.xlu1 %v170_v52 }
 0x24d   :  { %v172_v53 = vpop.xlane.xlu1 %171 }
 0x24e   :  { %v173_v54 = vrot.slane %v172_v53, 4 }
 0x250   :  { %v174_v55 = vadd.f32 %v173_v54, %v172_v53 }
 0x252   :  { %v175_v56 = vrot.slane %v174_v55, 2 }
 0x254   :  { %v176_v57 = vadd.f32 %v175_v56, %v174_v55 }
 0x256   :  { %v177_v58 = vrot.slane %v176_v57, 1 }
 0x258   :  { %v178_v59 = vadd.f32 %v177_v58, %v176_v57 }
 0x25a   :  { %207 = vpush %v178_v59 }
 0x28b   :  { %s208_s1 = spop %207 }
 0x28c   :  { %s180_s4 = smul.f32 0.015625, %s208_s1 }
 0x28e   :  { %182 = sst [smem:[#allocation7]] %s180_s4 }
 0x28f   :  { %275 = shalt.err (!%p272_p4)
}
 0x290   :  { %s286_s12 = smov [#allocation7]  }
 0x291   :  { %190 = dma.smem_to_hbm %s286_s12, 16, %s340_s2, [#allocation4]  }
 0x292   :  { %280 = dma.done.wait [#allocation4], 16  }
 0x293   :  { %281 = vsyncadd [#allocation4], 4294967280 }
 0x294   :  { %194 = sfence }
 0x295   :  { %195 = vsyncpa [#allocation3], 1 }
 0x296   :  { %196 = vsyncpa [#allocation6], 1 }
 0x297   :  { %197 = vsyncpa [#allocation4], 1 }

</bundles_post_ra>
